<compile_context>
chip_gen: v7x
topology: tpu7x:2x2x1
jax: 0.10.0
libtpu: 0.0.40
codegen_flags: <defaults>
</compile_context>

<pallas_src>
import functools

import jax
import jax.numpy as jnp
from jax import lax
from jax.experimental import pallas as pl
from jax.experimental.pallas import tpu as pltpu


def qfunction_kernel(xt_ref, w1_ref, b1_ref, w2_ref, b2_ref, out_ref):
    # xt:  (8, TB)    features on sublanes (4 real + 4 zero-pad), batch on lanes
    # w1:  (128, 8)   PyTorch (out_features, in_features), in-dim zero-padded 4->8
    # b1:  (128, 1)
    # w2:  (2, 128)   PyTorch layout
    # b2:  (2, 1)
    # out: (2, TB)    lane-dense transposed output
    # ---- layer 1 on the MXU: (128, 8) @ (8, TB) -> (128, TB), f32 accumulate.
    h = jnp.dot(w1_ref[...], xt_ref[...],
                preferred_element_type=jnp.float32,
                precision=lax.Precision.HIGHEST)
    h = jnp.maximum(h + b1_ref[...], 0.0)                    # bias + ReLU (VPU)
    # ---- layer 2 on the MXU: (2, 128) @ (128, TB) -> (2, TB); K=128 clean fit.
    out = jnp.dot(w2_ref[...], h,
                  preferred_element_type=jnp.float32,
                  precision=lax.Precision.HIGHEST) + b2_ref[...]
    out_ref[...] = out.astype(out_ref.dtype)


def _round_up(n, m):
    return ((n + m - 1) // m) * m


def _cdiv(a, b):
    return (a + b - 1) // b


@functools.partial(jax.jit, static_argnames=("tile_b",))
def qfunction_forward(x, w1, b1, w2, b2, *, tile_b=8192):
    """y = relu(x @ w1.T + b1) @ w2.T + b2  (PyTorch nn.Linear weight layout).

    x: (B, 4) f32; w1: (128, 4); b1: (128,); w2: (2, 128); b2: (2,).
    Returns (B, 2) f32.
    """
    B = x.shape[0]

    # Batch tile: always a multiple of 128 (lane width), capped by the padded
    # batch.  If the batch is big enough, keep >= 2 grid steps so v7x's two
    # TensorCores both get work (no-op cost on single-TC v5e/v6e).
    b128 = _round_up(max(B, 1), 128)
    tb = _round_up(min(int(tile_b), b128), 128)
    if b128 >= 256:
        tb = min(tb, _round_up(_cdiv(b128, 2), 128))
    b_pad = _round_up(B, tb)

    # Layout plumbing (one fused transpose+pad pass over x under jit):
    # batch onto lanes, zero-pad features 4 -> 8 and batch -> b_pad.
    xt = jnp.pad(x.astype(jnp.float32).T, ((0, 4), (0, b_pad - B)))   # (8, b_pad)
    w1p = jnp.pad(w1.astype(jnp.float32), ((0, 0), (0, 4)))           # (128, 8)
    b1c = b1.astype(jnp.float32).reshape(128, 1)
    w2f = w2.astype(jnp.float32)                                      # (2, 128)
    b2c = b2.astype(jnp.float32).reshape(2, 1)

    grid = (b_pad // tb,)
    out_t = pl.pallas_call(
        qfunction_kernel,
        out_shape=jax.ShapeDtypeStruct((2, b_pad), jnp.float32),
        grid=grid,
        in_specs=[
            pl.BlockSpec((8, tb), lambda i: (0, i)),      # x tile (streamed)
            pl.BlockSpec((128, 8), lambda i: (0, 0)),     # w1 (VMEM-resident)
            pl.BlockSpec((128, 1), lambda i: (0, 0)),     # b1
            pl.BlockSpec((2, 128), lambda i: (0, 0)),     # w2
            pl.BlockSpec((2, 1), lambda i: (0, 0)),       # b2
        ],
        out_specs=pl.BlockSpec((2, tb), lambda i: (0, i)),  # lane-dense output
        compiler_params=pltpu.CompilerParams(
            dimension_semantics=("parallel",)),             # v7x: 2 TCs split batch
    )(xt, w1p, b1c, w2f, b2c)

    return out_t[:, :B].T                                    # (B, 2)


def init_params(key):
    """nn.Linear-style init, PyTorch weight layout: U(-1/sqrt(fan_in), +1/sqrt(fan_in))."""
    k1, k2, k3, k4 = jax.random.split(key, 4)
    bound1 = 1.0 / jnp.sqrt(4.0)
    bound2 = 1.0 / jnp.sqrt(128.0)
    w1 = jax.random.uniform(k1, (128, 4), jnp.float32, -bound1, bound1)
    b1 = jax.random.uniform(k2, (128,), jnp.float32, -bound1, bound1)
    w2 = jax.random.uniform(k3, (2, 128), jnp.float32, -bound2, bound2)
    b2 = jax.random.uniform(k4, (2,), jnp.float32, -bound2, bound2)
    return w1, b1, w2, b2


def _reference(x, w1, b1, w2, b2):
    # Same f32-accurate matmul path as the kernel.
    h = jnp.maximum(
        jnp.dot(x, w1.T, precision=lax.Precision.HIGHEST) + b1, 0.0)
    return jnp.dot(h, w2.T, precision=lax.Precision.HIGHEST) + b2


if __name__ == "__main__":
    key = jax.random.PRNGKey(0)
    kx, kp, kx2 = jax.random.split(key, 3)
    w1, b1, w2, b2 = init_params(kp)

    # Small shape consistent with the module (CartPole-style 4-dim state).
    B = 8
    x = jax.random.normal(kx, (B, 4), jnp.float32)
    out = jax.block_until_ready(qfunction_forward(x, w1, b1, w2, b2))
    ref = _reference(x, w1, b1, w2, b2)
    assert out.shape == (B, 2)
    assert jnp.allclose(out, ref, atol=1e-4, rtol=1e-4)

    # Also exercise the gridded, padded multi-tile path (non-multiple batch).
    B2 = 1000
    x2 = jax.random.normal(kx2, (B2, 4), jnp.float32)
    out2 = jax.block_until_ready(qfunction_forward(x2, w1, b1, w2, b2, tile_b=256))
    ref2 = _reference(x2, w1, b1, w2, b2)
    assert out2.shape == (B2, 2)
    assert jnp.allclose(out2, ref2, atol=1e-4, rtol=1e-4)

    print("KERNEL_OK")
</pallas_src>

<mosaic_0001>
module attributes {stable_mosaic.version = 11 : i64} {
  func.func @qfunction_kernel(%arg0: i32, %arg1: memref<8x128xf32, #tpu.memory_space<vmem>>, %arg2: memref<128x8xf32, #tpu.memory_space<vmem>>, %arg3: memref<128x1xf32, #tpu.memory_space<vmem>>, %arg4: memref<2x128xf32, #tpu.memory_space<vmem>>, %arg5: memref<2x1xf32, #tpu.memory_space<vmem>>, %arg6: memref<2x128xf32, #tpu.memory_space<vmem>>) attributes {dimension_semantics = [#tpu.dimension_semantics<parallel>], iteration_bounds = array<i64: 1>, scalar_prefetch = 0 : i64, scratch_operands = 0 : i64, tpu.core_type = #tpu.core_type<tc>, window_params = [{transform_indices = @transform_0, window_bounds = array<i64: 8, 128>}, {pipeline_mode = #tpu.pipeline_mode<synchronous>, transform_indices = @transform_1, window_bounds = array<i64: 128, 8>}, {pipeline_mode = #tpu.pipeline_mode<synchronous>, transform_indices = @transform_2, window_bounds = array<i64: 128, 1>}, {pipeline_mode = #tpu.pipeline_mode<synchronous>, transform_indices = @transform_3, window_bounds = array<i64: 2, 128>}, {pipeline_mode = #tpu.pipeline_mode<synchronous>, transform_indices = @transform_4, window_bounds = array<i64: 2, 1>}, {transform_indices = @transform_5, window_bounds = array<i64: 2, 128>}]} {
    %c0 = arith.constant 0 : index
    %c0_0 = arith.constant 0 : index
    %0 = vector.load %arg2[%c0, %c0_0] : memref<128x8xf32, #tpu.memory_space<vmem>>, vector<128x8xf32>
    %c0_1 = arith.constant 0 : index
    %c0_2 = arith.constant 0 : index
    %1 = vector.load %arg1[%c0_1, %c0_2] : memref<8x128xf32, #tpu.memory_space<vmem>>, vector<8x128xf32>
    %cst = arith.constant dense<0.000000e+00> : vector<128x128xf32>
    %2 = tpu.matmul %0, %1, %cst {dimension_numbers = #tpu.dot_dimension_numbers<[1], [0], [0], [1], [0, 0, 1, 1], [], []>, precision = #tpu.contract_precision<fp32>} : vector<128x8xf32>, vector<8x128xf32>, vector<128x128xf32> -> vector<128x128xf32>
    %c0_3 = arith.constant 0 : index
    %c0_4 = arith.constant 0 : index
    %3 = vector.load %arg3[%c0_3, %c0_4] : memref<128x1xf32, #tpu.memory_space<vmem>>, vector<128x1xf32>
    %4 = vector.broadcast %3 : vector<128x1xf32> to vector<128x128xf32>
    %5 = arith.addf %2, %4 : vector<128x128xf32>
    %cst_5 = arith.constant 0.000000e+00 : f32
    %6 = vector.broadcast %cst_5 : f32 to vector<128x128xf32>
    %7 = arith.maximumf %5, %6 : vector<128x128xf32>
    %c0_6 = arith.constant 0 : index
    %c0_7 = arith.constant 0 : index
    %8 = vector.load %arg4[%c0_6, %c0_7] : memref<2x128xf32, #tpu.memory_space<vmem>>, vector<2x128xf32>
    %cst_8 = arith.constant dense<0.000000e+00> : vector<2x128xf32>
    %9 = tpu.matmul %8, %7, %cst_8 {dimension_numbers = #tpu.dot_dimension_numbers<[1], [0], [0], [1], [0, 0, 1, 1], [], []>, precision = #tpu.contract_precision<fp32>} : vector<2x128xf32>, vector<128x128xf32>, vector<2x128xf32> -> vector<2x128xf32>
    %c0_9 = arith.constant 0 : index
    %c0_10 = arith.constant 0 : index
    %10 = vector.load %arg5[%c0_9, %c0_10] : memref<2x1xf32, #tpu.memory_space<vmem>>, vector<2x1xf32>
    %11 = vector.broadcast %10 : vector<2x1xf32> to vector<2x128xf32>
    %12 = arith.addf %9, %11 : vector<2x128xf32>
    %c0_11 = arith.constant 0 : index
    %c0_12 = arith.constant 0 : index
    %13 = vector.load %arg6[%c0_11, %c0_12] : memref<2x128xf32, #tpu.memory_space<vmem>>, vector<2x128xf32>
    tpu.vector_store %arg6[%c0_11, %c0_12], %12 {strides = array<i32>} : memref<2x128xf32, #tpu.memory_space<vmem>>, vector<2x128xf32>,
    return
  }
  func.func @transform_0(%arg0: i32) -> (i32, i32) {
    %c0_i32 = arith.constant 0 : i32
    %c0_i32_0 = arith.constant 0 : i32
    return %c0_i32, %arg0 : i32, i32
  }
  func.func @transform_1(%arg0: i32) -> (i32, i32) {
    %c0_i32 = arith.constant 0 : i32
    %c0_i32_0 = arith.constant 0 : i32
    %c0_i32_1 = arith.constant 0 : i32
    return %c0_i32, %c0_i32_0 : i32, i32
  }
  func.func @transform_2(%arg0: i32) -> (i32, i32) {
    %c0_i32 = arith.constant 0 : i32
    %c0_i32_0 = arith.constant 0 : i32
    %c0_i32_1 = arith.constant 0 : i32
    return %c0_i32, %c0_i32_0 : i32, i32
  }
  func.func @transform_3(%arg0: i32) -> (i32, i32) {
    %c0_i32 = arith.constant 0 : i32
    %c0_i32_0 = arith.constant 0 : i32
    %c0_i32_1 = arith.constant 0 : i32
    return %c0_i32, %c0_i32_0 : i32, i32
  }
  func.func @transform_4(%arg0: i32) -> (i32, i32) {
    %c0_i32 = arith.constant 0 : i32
    %c0_i32_0 = arith.constant 0 : i32
    %c0_i32_1 = arith.constant 0 : i32
    return %c0_i32, %c0_i32_0 : i32, i32
  }
  func.func @transform_5(%arg0: i32) -> (i32, i32) {
    %c0_i32 = arith.constant 0 : i32
    %c0_i32_0 = arith.constant 0 : i32
    return %c0_i32, %arg0 : i32, i32
  }
}

</mosaic_0001>

<bundles_post_ra>
// kernel: qfunction_forward.1
= control target key start
LH: loop header
LB: loop body
LE: loop exit
PB: predicated region body
PF: predicated region fallthrough
CT: control target
= control target key end

     0   :  { %vm133_vm0 = vcmask 64512   ;;  %vm2771_vm1 = vmmov 0   ;;  %s3461_s0 = inlined_call_operand.vmem [shape: f32[8,128], index: 0, kind: input, shape index: {}]   ;;  %s3462_s1 = inlined_call_operand.vmem [shape: f32[128,8], index: 1, kind: input, shape index: {}]   ;;  %s3463_s2 = inlined_call_operand.vmem [shape: f32[128,1], index: 2, kind: input, shape index: {}]   ;;  %s3464_s4 = inlined_call_operand.vmem [shape: f32[2,1], index: 4, kind: input, shape index: {}]   ;;  %s3465_s3 = inlined_call_operand.vmem [shape: f32[2,128], index: 3, kind: input, shape index: {}]   ;;  %s3466_s5 = inlined_call_operand.vmem [shape: f32[2,128], index: 5, kind: output, shape index: {}]  }
   0x1   :  { %v36_v0 = vld [vmem:[%s3461_s0] sm:$0xff]  ;;  %v21_v2 = vld [vmem:[%s3462_s1 + $0x8] sm:$0xff]  ;;  %v22_v6 = vld [vmem:[%s3462_s1 + $0x10] sm:$0xff] }
   0x2   :  { %v20_v1 = vld [vmem:[%s3462_s1] sm:$0xff]  ;;  %v2812_v3 = vand.u32 4294901760, %v36_v0  ;;  %v138_v5 = vsel %vm133_vm0, %v21_v2, 0  ;;  %v23_v7 = vld [vmem:[%s3462_s1 + $0x18] sm:$0xff]  ;;  %v141_v11 = vsel %vm133_vm0, %v22_v6, 0  ;;  %v25_v13 = vld [vmem:[%s3462_s1 + $0x28] sm:$0xff] }
   0x3   :  { %v135_v4 = vsel %vm133_vm0, %v20_v1, 0  ;;  %v24_v8 = vld [vmem:[%s3462_s1 + $0x20] sm:$0xff]  ;;  %v2827_v10 = vand.u32 4294901760, %v138_v5  ;;  %v144_v12 = vsel %vm133_vm0, %v23_v7, 0  ;;  %v2838_v15 = vand.u32 4294901760, %v141_v11  ;;  %v26_v18 = vld [vmem:[%s3462_s1 + $0x30] sm:$0xff] }
   0x4   :  { %v2825_v9 = vand.u32 4294901760, %v135_v4  ;;  %2146 = vmatprep.subr.mxu0 %v2812_v3  ;;  %v2836_v14 = vsub.f32 %v36_v0, %v2812_v3  ;;  %v2840_v16 = vand.u32 4294901760, %v144_v12  ;;  %v147_v17 = vsel %vm133_vm0, %v24_v8, 0  ;;  %v27_v39 = vld [vmem:[%s3462_s1 + $0x38] sm:$0xff]  ;;  %v28_v44 = vld [vmem:[%s3462_s1 + $0x40] sm:$0xff]  ;;  %v29_v49 = vld [vmem:[%s3462_s1 + $0x48] sm:$0xff] }
   0x5   :  { %2147 = vmatpush3.msra.mxu0 %v2812_v3  ;;  %v2851_v20 = vsub.f32 %v138_v5, %v2827_v10  ;;  %v2853_v21 = vand.u32 4294901760, %v147_v17  ;;  %v150_v22 = vsel %vm133_vm0, %v25_v13, 0  ;;  %v2860_v24 = vsub.f32 %v141_v11, %v2838_v15  ;;  %v30_v50 = vld [vmem:[%s3462_s1 + $0x50] sm:$0xff]  ;;  %v31_v55 = vld [vmem:[%s3462_s1 + $0x58] sm:$0xff]  ;;  %v32_v60 = vld [vmem:[%s3462_s1 + $0x60] sm:$0xff] }
   0x6   :  { %v2848_v19 = vsub.f32 %v135_v4, %v2825_v9  ;;  %v2857_v23 = vand.u32 4294901760, %v2836_v14  ;;  %v2863_v25 = vsub.f32 %v144_v12, %v2840_v16  ;;  %v2865_v26 = vand.u32 4294901760, %v150_v22  ;;  %v33_v61 = vld [vmem:[%s3462_s1 + $0x68] sm:$0xff]  ;;  %v34_v13 = vld [vmem:[%s3462_s1 + $0x70] sm:$0xff] }
   0x7   :  { %v260_v28 = vand.u32 4294901760, %v2851_v20  ;;  %v2870_v29 = vsub.f32 %v147_v17, %v2853_v21  ;;  %v153_v30 = vsel %vm133_vm0, %v26_v18, 0  ;;  %v270_v32 = vand.u32 4294901760, %v2860_v24 }
   0x8   :  { %v250_v27 = vand.u32 4294901760, %v2848_v19  ;;  %v412_v31 = vsub.f32 %v2836_v14, %v2857_v23  ;;  %v280_v33 = vand.u32 4294901760, %v2863_v25  ;;  %v2878_v34 = vsub.f32 %v150_v22, %v2865_v26 }
   0x9   :  { %v261_v36 = vsub.f32 %v2851_v20, %v260_v28  ;;  %v290_v37 = vand.u32 4294901760, %v2870_v29  ;;  %v2887_v38 = vand.u32 4294901760, %v153_v30  ;;  %v271_v41 = vsub.f32 %v2860_v24, %v270_v32 }
   0xa   :  { %v251_v35 = vsub.f32 %v2848_v19, %v250_v27  ;;  %v413_v40 = vand.u32 4294901760, %v412_v31  ;;  %v281_v42 = vsub.f32 %v2863_v25, %v280_v33  ;;  %v300_v43 = vand.u32 4294901760, %v2878_v34 }
   0xb   :  { %v262_v46 = vand.u32 4294901760, %v261_v36  ;;  %v291_v47 = vsub.f32 %v2870_v29, %v290_v37  ;;  %v2906_v48 = vsub.f32 %v153_v30, %v2887_v38  ;;  %v272_v51 = vand.u32 4294901760, %v271_v41 }
   0xc   :  { %v252_v45 = vand.u32 4294901760, %v251_v35  ;;  %2172 = vmatprep.subr.mxu0 %v413_v40  ;;  %v282_v52 = vand.u32 4294901760, %v281_v42  ;;  %v301_v53 = vsub.f32 %v2878_v34, %v300_v43  ;;  %v156_v54 = vsel %vm133_vm0, %v27_v39, 0 }
   0xd   :  { %v292_v56 = vand.u32 4294901760, %v291_v47  ;;  %v310_v57 = vand.u32 4294901760, %v2906_v48  ;;  %v2922_v58 = vand.u32 4294901760, %v156_v54  ;;  %v159_v59 = vsel %vm133_vm0, %v28_v44, 0 }
   0xe   :  { %2148 = vmatprep.mubr.f32.mxu0 %v252_v45  ;;  %v302_v62 = vand.u32 4294901760, %v301_v53  ;;  %v2931_v63 = vand.u32 4294901760, %v159_v59  ;;  %v162_v0 = vsel %vm133_vm0, %v29_v49, 0  ;;  %v165_v1 = vsel %vm133_vm0, %v30_v50, 0  ;;  %v35_v49 = vld [vmem:[%s3462_s1 + $0x78] sm:$0xff] }
   0xf   :  { %2149 = vmatmul.mubr.f32.vlgmr.msra.gmra.mrb[0].mxu0 %v262_v46  ;;  %v311_v2 = vsub.f32 %v2906_v48, %v310_v57  ;;  %v2939_v4 = vsub.f32 %v156_v54, %v2922_v58  ;;  %v2941_v5 = vand.u32 4294901760, %v162_v0  ;;  %v2943_v6 = vand.u32 4294901760, %v165_v1 }
  0x10   :  { %2173 = vmatpush3.msra.mxu0 %v413_v40  ;;  %2151 = vmatprep.mubr.f32.mxu0 %v272_v51  ;;  %v2946_v7 = vsub.f32 %v159_v59, %v2931_v63  ;;  %v168_v8 = vsel %vm133_vm0, %v31_v55, 0  ;;  %v171_v11 = vsel %vm133_vm0, %v32_v60, 0  ;;  %v174_v12 = vsel %vm133_vm0, %v33_v61, 0 }
  0x11   :  { %2198 = vmatprep.subr.mxu0 %v2836_v14  ;;  %v312_v17 = vand.u32 4294901760, %v311_v2  ;;  %v320_v18 = vand.u32 4294901760, %v2939_v4  ;;  %v2957_v22 = vsub.f32 %v162_v0, %v2941_v5  ;;  %v2960_v30 = vsub.f32 %v165_v1, %v2943_v6 }
  0x12   :  { %v330_v31 = vand.u32 4294901760, %v2946_v7  ;;  %v2963_v35 = vand.u32 4294901760, %v168_v8  ;;  %v2965_v36 = vand.u32 4294901760, %v171_v11  ;;  %v2967_v39 = vand.u32 4294901760, %v174_v12 }
  0x13   :  { %2152 = vmatmul.mubr.f32.gmra.mrb[2].mxu0 %v282_v52  ;;  %v321_v40 = vsub.f32 %v2939_v4, %v320_v18  ;;  %v340_v41 = vand.u32 4294901760, %v2957_v22  ;;  %v350_v42 = vand.u32 4294901760, %v2960_v30  ;;  %v177_v44 = vsel %vm133_vm0, %v34_v13, 0 }
  0x14   :  { %2154 = vmatprep.mubr.f32.mxu0 %v292_v56  ;;  %v331_v45 = vsub.f32 %v2946_v7, %v330_v31  ;;  %v2979_v46 = vsub.f32 %v168_v8, %v2963_v35  ;;  %v2982_v47 = vsub.f32 %v171_v11, %v2965_v36  ;;  %v2988_v50 = vsub.f32 %v174_v12, %v2967_v39 }
  0x15   :  { %v2990_v51 = vand.u32 4294901760, %v177_v44  ;;  %v322_v52 = vand.u32 4294901760, %v321_v40  ;;  %v341_v53 = vsub.f32 %v2957_v22, %v340_v41  ;;  %v351_v54 = vsub.f32 %v2960_v30, %v350_v42 }
  0x16   :  { %v360_v55 = vand.u32 4294901760, %v2979_v46  ;;  %v332_v56 = vand.u32 4294901760, %v331_v45  ;;  %v370_v59 = vand.u32 4294901760, %v2982_v47  ;;  %v180_v61 = vsel %vm133_vm0, %v35_v49, 0 }
  0x17   :  { %2155 = vmatmul.mubr.f32.gmra.mrb[4].mxu0 %v302_v62  ;;  %v3001_v60 = vsub.f32 %v177_v44, %v2990_v51  ;;  %v3004_v62 = vand.u32 4294901760, %v180_v61  ;;  %v342_v0 = vand.u32 4294901760, %v341_v53  ;;  %v380_v2 = vand.u32 4294901760, %v2988_v50 }
  0x18   :  { %2157 = vmatprep.mubr.f32.mxu0 %v312_v17  ;;  %v361_v1 = vsub.f32 %v2979_v46, %v360_v55  ;;  %v352_v11 = vand.u32 4294901760, %v351_v54  ;;  %v371_v12 = vsub.f32 %v2982_v47, %v370_v59 }
  0x19   :  { %v3011_v8 = vsub.f32 %v180_v61, %v3004_v62  ;;  %v390_v13 = vand.u32 4294901760, %v3001_v60  ;;  %v381_v40 = vsub.f32 %v2988_v50, %v380_v2  ;;  %v37_v61 = vld [vmem:[%s3463_s2] sm:$0xff] }
  0x1a   :  { %v362_v17 = vand.u32 4294901760, %v361_v1  ;;  %v372_v45 = vand.u32 4294901760, %v371_v12  ;;  %v38_v1 = vld [vmem:[%s3463_s2 + $0x8] sm:$0xff]  ;;  %v41_v12 = vld [vmem:[%s3463_s2 + $0x20] sm:$0xff] }
  0x1b   :  { %2158 = vmatmul.mubr.f32.gmra.mrb[6].mxu0 %v322_v52  ;;  %v400_v44 = vand.u32 4294901760, %v3011_v8  ;;  %v391_v49 = vsub.f32 %v3001_v60, %v390_v13  ;;  %v382_v52 = vand.u32 4294901760, %v381_v40  ;;  %v43_v40 = vld [vmem:[%s3463_s2 + $0x30] sm:$0xff] }
  0x1c   :  { %2160 = vmatprep.mubr.f32.mxu0 %v332_v56 }
  0x1d   :  { %v401_v53 = vsub.f32 %v3011_v8, %v400_v44  ;;  %v392_v54 = vand.u32 4294901760, %v391_v49  ;;  %v45_v49 = vld [vmem:[%s3463_s2 + $0x40] sm:$0xff] }
  0x1f   :  { %2161 = vmatmul.mubr.f32.gmra.mrb[8].mxu0 %v342_v0  ;;  %v402_v56 = vand.u32 4294901760, %v401_v53  ;;  %v39_v0 = vld [vmem:[%s3463_s2 + $0x10] sm:$0xff] }
  0x20   :  { %2163 = vmatprep.mubr.f32.mxu0 %v352_v11  ;;  %v40_v11 = vld [vmem:[%s3463_s2 + $0x18] sm:$0xff]  ;;  %v47_v53 = vld [vmem:[%s3463_s2 + $0x50] sm:$0xff] }
  0x23   :  { %2164 = vmatmul.mubr.f32.gmra.mrb[10].mxu0 %v362_v17  ;;  %v42_v17 = vld [vmem:[%s3463_s2 + $0x28] sm:$0xff] }
  0x24   :  { %2166 = vmatprep.mubr.f32.mxu0 %v372_v45  ;;  %v44_v45 = vld [vmem:[%s3463_s2 + $0x38] sm:$0xff] }
  0x27   :  { %2167 = vmatmul.mubr.f32.gmra.mrb[12].mxu0 %v382_v52  ;;  %v46_v52 = vld [vmem:[%s3463_s2 + $0x48] sm:$0xff] }
  0x28   :  { %2169 = vmatprep.mubr.f32.mxu0 %v392_v54  ;;  %v48_v54 = vld [vmem:[%s3463_s2 + $0x58] sm:$0xff] }
  0x2b   :  { %2170 = vmatmul.mubr.f32.gmra.mrb[14].mxu0 %v402_v56  ;;  %v49_v56 = vld [vmem:[%s3463_s2 + $0x60] sm:$0xff] }
  0x2c   :  { %2174 = vmatprep.mubr.f32.mxu0 %v2825_v9 }
  0x2f   :  { %2175 = vmatmul.mubr.f32.vlgmr.msra.gmra.mrb[0].mxu0 %v2827_v10 }
  0x30   :  { %2199 = vmatpush3.msra.mxu0 %v2836_v14  ;;  %2177 = vmatprep.mubr.f32.mxu0 %v2838_v15  ;;  %v2769_v14 = vmov 0  }
  0x31   :  { %2224 = vmatprep.subr.mxu0 %v2812_v3  ;;  %2767 = vset.pattern.permute.xlu0 %v2769_v14 }
  0x32   :  { %55 = vperm.xlu0 %2767, %v37_v61   ;;  %2768 = vset.pattern.permute.xlu1 %v2769_v14  ;;  %v50_v14 = vld [vmem:[%s3463_s2 + $0x68] sm:$0xff]  ;;  %v51_v61 = vld [vmem:[%s3463_s2 + $0x70] sm:$0xff] }
  0x33   :  { %2178 = vmatmul.mubr.f32.gmra.mrb[2].mxu0 %v2840_v16  ;;  %65 = vperm.xlu1 %2768, %v39_v0   ;;  %v52_v0 = vld [vmem:[%s3463_s2 + $0x78] sm:$0xff] }
  0x34   :  { %2180 = vmatprep.mubr.f32.mxu0 %v2853_v21 }
  0x36   :  { %60 = vperm.xlu0 %2767, %v38_v1   ;;  %v1290_v1 = vld [vmem:[%s3464_s4] sm:$0x3] }
  0x37   :  { %2181 = vmatmul.mubr.f32.gmra.mrb[4].mxu0 %v2865_v26  ;;  %70 = vperm.xlu1 %2768, %v40_v11  }
  0x38   :  { %2183 = vmatprep.mubr.f32.mxu0 %v2887_v38 }
  0x3a   :  { %75 = vperm.xlu0 %2767, %v41_v12  }
  0x3b   :  { %2184 = vmatmul.mubr.f32.gmra.mrb[6].mxu0 %v2922_v58  ;;  %80 = vperm.xlu1 %2768, %v42_v17  }
  0x3c   :  { %2186 = vmatprep.mubr.f32.mxu0 %v2931_v63 }
  0x3e   :  { %85 = vperm.xlu0 %2767, %v43_v40  }
  0x3f   :  { %2187 = vmatmul.mubr.f32.gmra.mrb[8].mxu0 %v2941_v5  ;;  %90 = vperm.xlu1 %2768, %v44_v45  }
  0x40   :  { %2189 = vmatprep.mubr.f32.mxu0 %v2943_v6 }
  0x42   :  { %95 = vperm.xlu0 %2767, %v45_v49  }
  0x43   :  { %2190 = vmatmul.mubr.f32.gmra.mrb[10].mxu0 %v2963_v35  ;;  %100 = vperm.xlu1 %2768, %v46_v52  }
  0x44   :  { %2192 = vmatprep.mubr.f32.mxu0 %v2965_v36 }
  0x46   :  { %105 = vperm.xlu0 %2767, %v47_v53  }
  0x47   :  { %2193 = vmatmul.mubr.f32.gmra.mrb[12].mxu0 %v2967_v39  ;;  %110 = vperm.xlu1 %2768, %v48_v54  }
  0x48   :  { %2195 = vmatprep.mubr.f32.mxu0 %v2990_v51 }
  0x4a   :  { %115 = vperm.xlu0 %2767, %v49_v56  }
  0x4b   :  { %2196 = vmatmul.mubr.f32.gmra.mrb[14].mxu0 %v3004_v62  ;;  %120 = vperm.xlu1 %2768, %v50_v14  }
  0x4c   :  { %2200 = vmatprep.mubr.f32.mxu0 %v2848_v19  ;;  %v1289_v19 = vld [vmem:[%s3465_s3] sm:$0x3] }
  0x4e   :  { %125 = vperm.xlu0 %2767, %v51_v61  }
  0x4f   :  { %2201 = vmatmul.mubr.f32.vlgmr.msra.gmra.mrb[0].mxu0 %v2851_v20  ;;  %130 = vperm.xlu1 %2768, %v52_v0  }
  0x50   :  { %2225 = vmatpush3.msra.mxu0 %v2812_v3  ;;  %2203 = vmatprep.mubr.f32.mxu0 %v2860_v24 }
  0x51   :  { %2250 = vmatprep.subr.mxu0 %v2857_v23 }
  0x52   :  { %1293 = vperm.xlu0 %2767, %v1290_v1  }
  0x53   :  { %2204 = vmatmul.mubr.f32.gmra.mrb[2].mxu0 %v2863_v25 }
  0x54   :  { %2206 = vmatprep.mubr.f32.mxu0 %v2870_v29 }
  0x57   :  { %2207 = vmatmul.mubr.f32.gmra.mrb[4].mxu0 %v2878_v34 }
  0x58   :  { %2209 = vmatprep.mubr.f32.mxu0 %v2906_v48 }
  0x5b   :  { %2210 = vmatmul.mubr.f32.gmra.mrb[6].mxu0 %v2939_v4 }
  0x5c   :  { %2212 = vmatprep.mubr.f32.mxu0 %v2946_v7 }
  0x5f   :  { %2213 = vmatmul.mubr.f32.gmra.mrb[8].mxu0 %v2957_v22 }
  0x60   :  { %2215 = vmatprep.mubr.f32.mxu0 %v2960_v30 }
  0x63   :  { %2216 = vmatmul.mubr.f32.gmra.mrb[10].mxu0 %v2979_v46 }
  0x64   :  { %2218 = vmatprep.mubr.f32.mxu0 %v2982_v47 }
  0x67   :  { %2219 = vmatmul.mubr.f32.gmra.mrb[12].mxu0 %v2988_v50 }
  0x68   :  { %2221 = vmatprep.mubr.f32.mxu0 %v3001_v60 }
  0x6b   :  { %2222 = vmatmul.mubr.f32.gmra.mrb[14].mxu0 %v3011_v8 }
  0x6c   :  { %2226 = vmatprep.mubr.f32.mxu0 %v250_v27 }
  0x6f   :  { %2227 = vmatmul.mubr.f32.vlgmr.msra.gmra.mrb[0].mxu0 %v260_v28 }
  0x70   :  { %2251 = vmatpush3.msra.mxu0 %v2857_v23  ;;  %2229 = vmatprep.mubr.f32.mxu0 %v270_v32 }
  0x71   :  { %2276 = vmatprep.subr.mxu0 %v2812_v3 }
  0x73   :  { %2230 = vmatmul.mubr.f32.gmra.mrb[2].mxu0 %v280_v33 }
  0x74   :  { %2232 = vmatprep.mubr.f32.mxu0 %v290_v37 }
  0x77   :  { %2233 = vmatmul.mubr.f32.gmra.mrb[4].mxu0 %v300_v43 }
  0x78   :  { %2235 = vmatprep.mubr.f32.mxu0 %v310_v57 }
  0x7b   :  { %2236 = vmatmul.mubr.f32.gmra.mrb[6].mxu0 %v320_v18 }
  0x7c   :  { %2238 = vmatprep.mubr.f32.mxu0 %v330_v31 }
  0x7f   :  { %2239 = vmatmul.mubr.f32.gmra.mrb[8].mxu0 %v340_v41 }
  0x80   :  { %2241 = vmatprep.mubr.f32.mxu0 %v350_v42 }
  0x83   :  { %2242 = vmatmul.mubr.f32.gmra.mrb[10].mxu0 %v360_v55 }
  0x84   :  { %2244 = vmatprep.mubr.f32.mxu0 %v370_v59 }
  0x87   :  { %2245 = vmatmul.mubr.f32.gmra.mrb[12].mxu0 %v380_v2 }
  0x88   :  { %2247 = vmatprep.mubr.f32.mxu0 %v390_v13 }
  0x8b   :  { %2248 = vmatmul.mubr.f32.gmra.mrb[14].mxu0 %v400_v44 }
  0x8c   :  { %2252 = vmatprep.mubr.f32.mxu0 %v2825_v9 }
  0x8f   :  { %2253 = vmatmul.mubr.f32.vlgmr.msra.gmra.mrb[0].mxu0 %v2827_v10 }
  0x90   :  { %2277 = vmatpush3.msra.mxu0 %v2812_v3  ;;  %2255 = vmatprep.mubr.f32.mxu0 %v2838_v15  ;;  %v2770_v3 = vmov 0.0|0.0  }
  0x91   :  { %2512 = vmatprep.subr.bf16.mxu1 %v2770_v3 }
  0x93   :  { %2256 = vmatmul.mubr.f32.gmra.mrb[2].mxu0 %v2840_v16 }
  0x94   :  { %2258 = vmatprep.mubr.f32.mxu0 %v2853_v21 }
  0x97   :  { %2259 = vmatmul.mubr.f32.gmra.mrb[4].mxu0 %v2865_v26 }
  0x98   :  { %2261 = vmatprep.mubr.f32.mxu0 %v2887_v38 }
  0x9b   :  { %2262 = vmatmul.mubr.f32.gmra.mrb[6].mxu0 %v2922_v58 }
  0x9c   :  { %2264 = vmatprep.mubr.f32.mxu0 %v2931_v63 }
  0x9f   :  { %2265 = vmatmul.mubr.f32.gmra.mrb[8].mxu0 %v2941_v5 }
  0xa0   :  { %2267 = vmatprep.mubr.f32.mxu0 %v2943_v6 }
  0xa3   :  { %2268 = vmatmul.mubr.f32.gmra.mrb[10].mxu0 %v2963_v35 }
  0xa4   :  { %2270 = vmatprep.mubr.f32.mxu0 %v2965_v36 }
  0xa7   :  { %2271 = vmatmul.mubr.f32.gmra.mrb[12].mxu0 %v2967_v39 }
  0xa8   :  { %2273 = vmatprep.mubr.f32.mxu0 %v2990_v51 }
  0xab   :  { %2274 = vmatmul.mubr.f32.gmra.mrb[14].mxu0 %v3004_v62 }
  0xac   :  { %2278 = vmatprep.mubr.f32.mxu0 %v2825_v9  ;;  %v3468_v9 = vmov 0.0  }
  0xad   :  { %2334 = vmatprep.mubr.msk.f32.mxu1 %vm2771_vm1, %v3468_v9 }
  0xaf   :  { %2279 = vmatmul.mubr.f32.vlgmr.msra.gmra.mrb[0].mxu0 %v2827_v10 }
  0xb0   :  { %2281 = vmatprep.mubr.f32.mxu0 %v2838_v15 }
  0xb1   :  { %v56_v15 = vpop.permute.xlu0 %55 }
  0xb2   :  { %v66_v10 = vpop.permute.xlu1 %65 }
  0xb3   :  { %2282 = vmatmul.mubr.f32.gmra.mrb[2].mxu0 %v2840_v16 }
  0xb4   :  { %2284 = vmatprep.mubr.f32.mxu0 %v2853_v21  ;;  %v3187_v21 = vand.u32 4294901760, %v1289_v19 }
  0xb5   :  { %v61_v20 = vpop.permute.xlu0 %60 }
  0xb6   :  { %v71_v16 = vpop.permute.xlu1 %70  ;;  %v3190_v25 = vsub.f32 %v1289_v19, %v3187_v21 }
  0xb7   :  { %2285 = vmatmul.mubr.f32.gmra.mrb[4].mxu0 %v2865_v26 }
  0xb8   :  { %2287 = vmatprep.mubr.f32.mxu0 %v2887_v38  ;;  %v3467_v33 = vand.u32 4294901760, %v3190_v25 }
  0xb9   :  { %v76_v24 = vpop.permute.xlu0 %75 }
  0xba   :  { %v81_v23 = vpop.permute.xlu1 %80  ;;  %v3198_v7 = vsub.f32 %v3190_v25, %v3467_v33 }
  0xbb   :  { %2288 = vmatmul.mubr.f32.gmra.mrb[6].mxu0 %v2922_v58 }
  0xbc   :  { %2290 = vmatprep.mubr.f32.mxu0 %v2931_v63 }
  0xbd   :  { %v86_v43 = vpop.permute.xlu0 %85 }
  0xbe   :  { %v91_v34 = vpop.permute.xlu1 %90 }
  0xbf   :  { %2291 = vmatmul.mubr.f32.gmra.mrb[8].mxu0 %v2941_v5 }
  0xc0   :  { %2293 = vmatprep.mubr.f32.mxu0 %v2943_v6 }
  0xc1   :  { %v96_v55 = vpop.permute.xlu0 %95 }
  0xc2   :  { %v101_v42 = vpop.permute.xlu1 %100 }
  0xc3   :  { %2294 = vmatmul.mubr.f32.gmra.mrb[10].mxu0 %v2963_v35 }
  0xc4   :  { %2296 = vmatprep.mubr.f32.mxu0 %v2965_v36 }
  0xc7   :  { %2297 = vmatmul.mubr.f32.gmra.mrb[12].mxu0 %v2967_v39 }
  0xc8   :  { %2299 = vmatprep.mubr.f32.mxu0 %v2990_v51 }
  0xcb   :  { %2300 = vmatmul.mubr.f32.gmra.mrb[14].mxu0 %v3004_v62 }
 0x182   :  { %v2280_v26 = vpop.f32.mrb[0].mxu0 }
 0x183   :  { %v2656_v27 = vadd.f32 %v2280_v26, %v61_v20  ;;  %v1179_v28 = vpop.f32.mrb[1].mxu0  ;;  %v106_v26 = vpop.permute.xlu0 %105 }
 0x184   :  { %v2657_v29 = vadd.f32 %v1179_v28, %v56_v15  ;;  %v111_v15 = vpop.permute.xlu1 %110 }
 0x185   :  { %v1274_v32 = vmax.f32 %v2656_v27, 0.0 }
 0x186   :  { %v1273_v37 = vmax.f32 %v2657_v29, 0.0  ;;  %v2283_v38 = vpop.f32.mrb[2].mxu0 }
 0x187   :  { %v1300_v48 = vand.u32 4294901760, %v1274_v32  ;;  %v2658_v57 = vadd.f32 %v2283_v38, %v71_v16  ;;  %v1191_v58 = vpop.f32.mrb[3].mxu0 }
 0x188   :  { %v1297_v63 = vand.u32 4294901760, %v1273_v37  ;;  %v2659_v4 = vadd.f32 %v1191_v58, %v66_v10 }
 0x189   :  { %v3193_v5 = vsub.f32 %v1274_v32, %v1300_v48  ;;  %v1276_v6 = vmax.f32 %v2658_v57, 0.0 }
 0x18a   :  { %v3200_v18 = vsub.f32 %v1273_v37, %v1297_v63  ;;  %v1275_v22 = vmax.f32 %v2659_v4, 0.0  ;;  %v2286_v30 = vpop.f32.mrb[4].mxu0  ;;  %v3202_v31 = vpack.c.bf16 %v1300_v48, %v1297_v63 }
 0x18b   :  { %v1397_v35 = vand.u32 4294901760, %v3193_v5  ;;  %v1306_v36 = vand.u32 4294901760, %v1276_v6  ;;  %v2660_v39 = vadd.f32 %v2286_v30, %v81_v23  ;;  %v1203_v41 = vpop.f32.mrb[5].mxu0 }
 0x18c   :  { %v1390_v46 = vand.u32 4294901760, %v3200_v18  ;;  %v1303_v47 = vand.u32 4294901760, %v1275_v22  ;;  %v2661_v50 = vadd.f32 %v1203_v41, %v76_v24  ;;  %2514 = vmatpush3.bf16.msra.mxu1 %v3202_v31 }
 0x18d   :  { %v1398_v59 = vsub.f32 %v3193_v5, %v1397_v35  ;;  %v3212_v60 = vsub.f32 %v1276_v6, %v1306_v36  ;;  %v1278_v62 = vmax.f32 %v2660_v39, 0.0  ;;  %2515 = vmatprep.subr.bf16.mxu1 %v2770_v3 }
 0x18e   :  { %v1391_v8 = vsub.f32 %v3200_v18, %v1390_v46  ;;  %v3219_v13 = vsub.f32 %v1275_v22, %v1303_v47  ;;  %v1277_v44 = vmax.f32 %v2661_v50, 0.0  ;;  %v2289_v11 = vpop.f32.mrb[6].mxu0  ;;  %v3221_v12 = vpack.c.bf16 %v1306_v36, %v1303_v47 }
 0x18f   :  { %v1399_v17 = vand.u32 4294901760, %v1398_v59  ;;  %v1411_v40 = vand.u32 4294901760, %v3212_v60  ;;  %v1312_v45 = vand.u32 4294901760, %v1278_v62  ;;  %v2662_v49 = vadd.f32 %v2289_v11, %v91_v34  ;;  %v1215_v52 = vpop.f32.mrb[7].mxu0  ;;  %v121_v59 = vpop.permute.xlu1 %120 }
 0x190   :  { %v1392_v53 = vand.u32 4294901760, %v1391_v8  ;;  %v1404_v54 = vand.u32 4294901760, %v3219_v13  ;;  %v1309_v56 = vand.u32 4294901760, %v1277_v44  ;;  %v2663_v14 = vadd.f32 %v1215_v52, %v86_v43  ;;  %2517 = vmatpush3.bf16.msra.mxu1 %v3221_v12 }
 0x191   :  { %v1412_v61 = vsub.f32 %v3212_v60, %v1411_v40  ;;  %v3229_v0 = vsub.f32 %v1278_v62, %v1312_v45  ;;  %v1280_v1 = vmax.f32 %v2662_v49, 0.0  ;;  %2518 = vmatprep.subr.bf16.mxu1 %v2770_v3 }
 0x192   :  { %v1405_v16 = vsub.f32 %v3219_v13, %v1404_v54  ;;  %v3237_v19 = vsub.f32 %v1277_v44, %v1309_v56  ;;  %v1279_v20 = vmax.f32 %v2663_v14, 0.0  ;;  %v2292_v23 = vpop.f32.mrb[8].mxu0  ;;  %v3239_v24 = vpack.c.bf16 %v1312_v45, %v1309_v56 }
 0x193   :  { %v1413_v27 = vand.u32 4294901760, %v1412_v61  ;;  %v1425_v28 = vand.u32 4294901760, %v3229_v0  ;;  %v1318_v29 = vand.u32 4294901760, %v1280_v1  ;;  %v2664_v32 = vadd.f32 %v2292_v23, %v101_v42  ;;  %v1227_v34 = vpop.f32.mrb[9].mxu0 }
 0x194   :  { %v1406_v37 = vand.u32 4294901760, %v1405_v16  ;;  %v1418_v38 = vand.u32 4294901760, %v3237_v19  ;;  %v1315_v43 = vand.u32 4294901760, %v1279_v20  ;;  %v2665_v48 = vadd.f32 %v1227_v34, %v96_v55  ;;  %2520 = vmatpush3.bf16.msra.mxu1 %v3239_v24 }
 0x195   :  { %v1426_v57 = vsub.f32 %v3229_v0, %v1425_v28  ;;  %v3247_v58 = vsub.f32 %v1280_v1, %v1318_v29  ;;  %v1282_v63 = vmax.f32 %v2664_v32, 0.0  ;;  %2521 = vmatprep.subr.bf16.mxu1 %v2770_v3  ;;  %v3250_v4 = vpack.c.bf16 %v1399_v17, %v1392_v53  ;;  %v116_v17 = vpop.permute.xlu0 %115 }
 0x196   :  { %v1419_v6 = vsub.f32 %v3237_v19, %v1418_v38  ;;  %v3255_v22 = vsub.f32 %v1279_v20, %v1315_v43  ;;  %v1281_v30 = vmax.f32 %v2665_v48, 0.0  ;;  %v2295_v36 = vpop.f32.mrb[10].mxu0  ;;  %v3257_v39 = vpack.c.bf16 %v1318_v29, %v1315_v43 }
 0x197   :  { %v1427_v41 = vand.u32 4294901760, %v1426_v57  ;;  %v1439_v42 = vand.u32 4294901760, %v3247_v58  ;;  %v1324_v47 = vand.u32 4294901760, %v1282_v63  ;;  %v2666_v50 = vadd.f32 %v2295_v36, %v111_v15  ;;  %v1239_v55 = vpop.f32.mrb[11].mxu0 }
 0x198   :  { %v1420_v62 = vand.u32 4294901760, %v1419_v6  ;;  %v1432_v8 = vand.u32 4294901760, %v3255_v22  ;;  %v1321_v44 = vand.u32 4294901760, %v1281_v30  ;;  %v2667_v11 = vadd.f32 %v1239_v55, %v106_v26  ;;  %2523 = vmatpush3.bf16.msra.mxu1 %v3257_v39  ;;  %v131_v6 = vpop.permute.xlu1 %130 }
 0x199   :  { %v1440_v45 = vsub.f32 %v3247_v58, %v1439_v42  ;;  %v3265_v49 = vsub.f32 %v1282_v63, %v1324_v47  ;;  %v1284_v52 = vmax.f32 %v2666_v50, 0.0  ;;  %2524 = vmatprep.subr.bf16.mxu1 %v2770_v3  ;;  %v3268_v53 = vpack.c.bf16 %v1413_v27, %v1406_v37 }
 0x19a   :  { %v1433_v56 = vsub.f32 %v3255_v22, %v1432_v8  ;;  %v3273_v14 = vsub.f32 %v1281_v30, %v1321_v44  ;;  %v1283_v61 = vmax.f32 %v2667_v11, 0.0  ;;  %v2298_v1 = vpop.f32.mrb[12].mxu0  ;;  %v3275_v15 = vpack.c.bf16 %v1324_v47, %v1321_v44 }
 0x19b   :  { %v1441_v16 = vand.u32 4294901760, %v1440_v45  ;;  %v3470_v20 = vand.u32 4294901760, %v3265_v49  ;;  %v1330_v23 = vand.u32 4294901760, %v1284_v52  ;;  %v2668_v26 = vadd.f32 %v2298_v1, %v121_v59  ;;  %v1251_v29 = vpop.f32.mrb[13].mxu0  ;;  %v126_v59 = vpop.permute.xlu0 %125 }
 0x19c   :  { %v1434_v32 = vand.u32 4294901760, %v1433_v56  ;;  %v1446_v27 = vand.u32 4294901760, %v3273_v14  ;;  %v1327_v34 = vand.u32 4294901760, %v1283_v61  ;;  %v2669_v37 = vadd.f32 %v1251_v29, %v116_v17  ;;  %2526 = vmatpush3.bf16.msra.mxu1 %v3275_v15 }
 0x19d   :  { %v1454_v43 = vsub.f32 %v3265_v49, %v3470_v20  ;;  %v3283_v48 = vsub.f32 %v1284_v52, %v1330_v23  ;;  %v1286_v57 = vmax.f32 %v2668_v26, 0.0  ;;  %2527 = vmatprep.subr.bf16.mxu1 %v2770_v3  ;;  %v3286_v63 = vpack.c.bf16 %v1427_v41, %v1420_v62 }
 0x19e   :  { %v1447_v30 = vsub.f32 %v3273_v14, %v1446_v27  ;;  %v3291_v36 = vsub.f32 %v1283_v61, %v1327_v34  ;;  %v1285_v47 = vmax.f32 %v2669_v37, 0.0  ;;  %v2301_v50 = vpop.f32.mrb[14].mxu0  ;;  %v3293_v55 = vpack.c.bf16 %v1330_v23, %v1327_v34 }
 0x19f   :  { %v1455_v44 = vand.u32 4294901760, %v1454_v43  ;;  %v1467_v11 = vand.u32 4294901760, %v3283_v48  ;;  %v1336_v17 = vand.u32 4294901760, %v1286_v57  ;;  %v2670_v45 = vadd.f32 %v2301_v50, %v131_v6  ;;  %v1263_v52 = vpop.f32.mrb[15].mxu0 }
 0x1a0   :  { %v1448_v41 = vand.u32 4294901760, %v1447_v30  ;;  %v1460_v62 = vand.u32 4294901760, %v3291_v36  ;;  %v1333_v56 = vand.u32 4294901760, %v1285_v47  ;;  %v2671_v1 = vadd.f32 %v1263_v52, %v126_v59  ;;  %2529 = vmatpush3.bf16.msra.mxu1 %v3293_v55 }
 0x1a1   :  { %v1468_v61 = vsub.f32 %v3283_v48, %v1467_v11  ;;  %v3299_v26 = vsub.f32 %v1286_v57, %v1336_v17  ;;  %v1288_v23 = vmax.f32 %v2670_v45, 0.0  ;;  %2530 = vmatprep.subr.bf16.mxu1 %v2770_v3  ;;  %v2546_v29 = vpack.c.bf16 %v1441_v16, %v1434_v32 }
 0x1a2   :  { %v1461_v34 = vsub.f32 %v3291_v36, %v1460_v62  ;;  %v3303_v37 = vsub.f32 %v1285_v47, %v1333_v56  ;;  %v1287_v43 = vmax.f32 %v2671_v1, 0.0  ;;  %v3305_v6 = vpack.c.bf16 %v1336_v17, %v1333_v56 }
 0x1a3   :  { %v1469_v30 = vand.u32 4294901760, %v1468_v61  ;;  %v1481_v50 = vand.u32 4294901760, %v3299_v26  ;;  %v1342_v59 = vand.u32 4294901760, %v1288_v23  ;;  %v2549_v52 = vpack.c.bf16 %v1455_v44, %v1448_v41 }
 0x1a4   :  { %v1462_v33 = vand.u32 4294901760, %v1461_v34  ;;  %v1474_v57 = vand.u32 4294901760, %v3303_v37  ;;  %v1339_v10 = vand.u32 4294901760, %v1287_v43  ;;  %2532 = vmatpush3.bf16.msra.mxu1 %v3305_v6  ;;  %v2567_v16 = vpack.c.bf16 %v3229_v0, %v3237_v19 }
 0x1a5   :  { %v1482_v32 = vsub.f32 %v3299_v26, %v1481_v50  ;;  %v3313_v47 = vsub.f32 %v1288_v23, %v1342_v59  ;;  %2533 = vmatprep.subr.bf16.mxu1 %v2770_v3  ;;  %v2570_v17 = vpack.c.bf16 %v3247_v58, %v3255_v22  ;;  %v2573_v44 = vpack.c.bf16 %v3265_v49, %v3273_v14 }
 0x1a6   :  { %v1475_v45 = vsub.f32 %v3303_v37, %v1474_v57  ;;  %v1487_v41 = vsub.f32 %v1287_v43, %v1339_v10  ;;  %v3321_v56 = vpack.c.bf16 %v1342_v59, %v1339_v10  ;;  %v2552_v1 = vpack.c.bf16 %v1469_v30, %v1462_v33 }
 0x1a7   :  { %v1483_v61 = vand.u32 4294901760, %v1482_v32  ;;  %v1495_v34 = vand.u32 4294901760, %v3313_v47  ;;  %v2576_v23 = vpack.c.bf16 %v3283_v48, %v3291_v36  ;;  %v2579_v51 = vpack.c.bf16 %v3299_v26, %v3303_v37 }
 0x1a8   :  { %v1476_v9 = vand.u32 4294901760, %v1475_v45  ;;  %v1488_v2 = vand.u32 4294901760, %v1487_v41  ;;  %2535 = vmatpush3.bf16.msra.mxu1 %v3321_v56  ;;  %v2582_v20 = vpack.c.bf16 %v3313_v47, %v1487_v41  ;;  %v3334_v33 = vpack.c.bf16 %v1397_v35, %v1390_v46 }
 0x1a9   :  { %v1496_v10 = vsub.f32 %v3313_v47, %v1495_v34  ;;  %2536 = vmatprep.subr.bf16.mxu1 %v2770_v3  ;;  %v3342_v48 = vpack.c.bf16 %v1411_v40, %v1404_v54  ;;  %v3348_v36 = vpack.c.bf16 %v1425_v28, %v1418_v38  ;;  %v3354_v35 = vpack.c.bf16 %v1439_v42, %v1432_v8 }
 0x1aa   :  { %v1489_v46 = vsub.f32 %v1487_v41, %v1488_v2  ;;  %v2555_v26 = vpack.c.bf16 %v1483_v61, %v1476_v9  ;;  %v3471_v37 = vand.u32 4294901760, %v3265_v49  ;;  %v3362_v54 = vpack.c.bf16 %v1467_v11, %v1460_v62 }
 0x1ab   :  { %v1497_v19 = vand.u32 4294901760, %v1496_v10  ;;  %v3472_v0 = vand.u32 4294901760, %v3198_v7  ;;  %v3366_v28 = vpack.c.bf16 %v1481_v50, %v1474_v57  ;;  %v3368_v38 = vpack.c.bf16 %v1495_v34, %v1488_v2 }
 0x1ac   :  { %v3360_v40 = vpack.c.bf16 %v3471_v37, %v1446_v27  ;;  %v1490_v58 = vand.u32 4294901760, %v1489_v46  ;;  %v3473_v9 = vmov 0.0   ;;  %v3474_v7 = vpack.c.bf16 %v3193_v5, %v3200_v18 }
 0x1ad   :  { %2335 = vmatmul.mubr.f32.vlgmr.msra.gmra.mrb[0].mxu1 %v3472_v0  ;;  %v3475_v2 = vpack.c.bf16 %v3212_v60, %v3219_v13  ;;  %v3476_v5 = vand.u32 4294901760, %v3190_v25 }
 0x1ae   :  { %2538 = vmatpush3.bf16.msra.mxu1 %v3250_v4  ;;  %2369 = vmatprep.mubr.msk.f32.mxu1 %vm2771_vm1, %v3473_v9  ;;  %v2558_v22 = vpack.c.bf16 %v1497_v19, %v1490_v58 }
 0x1af   :  { %2539 = vmatprep.subr.bf16.mxu1 %v2770_v3 }
 0x1b2   :  { %2541 = vmatpush3.bf16.msra.mxu1 %v3268_v53 }
 0x1b3   :  { %2542 = vmatprep.subr.bf16.mxu1 %v2770_v3 }
 0x1b6   :  { %2544 = vmatpush3.bf16.msra.mxu1 %v3286_v63 }
 0x1b7   :  { %2545 = vmatprep.subr.bf16.mxu1 %v2770_v3 }
 0x1ba   :  { %2547 = vmatpush3.bf16.msra.mxu1 %v2546_v29 }
 0x1bb   :  { %2548 = vmatprep.subr.bf16.mxu1 %v2770_v3 }
 0x1be   :  { %2550 = vmatpush3.bf16.msra.mxu1 %v2549_v52 }
 0x1bf   :  { %2551 = vmatprep.subr.bf16.mxu1 %v2770_v3 }
 0x1c2   :  { %2553 = vmatpush3.bf16.msra.mxu1 %v2552_v1 }
 0x1c3   :  { %2554 = vmatprep.subr.bf16.mxu1 %v2770_v3 }
 0x1c6   :  { %2556 = vmatpush3.bf16.msra.mxu1 %v2555_v26 }
 0x1c7   :  { %2557 = vmatprep.subr.bf16.mxu1 %v2770_v3 }
 0x1ca   :  { %2559 = vmatpush3.bf16.msra.mxu1 %v2558_v22 }
 0x1cb   :  { %2560 = vmatprep.subr.bf16.mxu1 %v2770_v3 }
 0x1cd   :  { %2370 = vmatmul.mubr.f32.vlgmr.msra.gmra.mrb[0].mxu1 %v3187_v21 }
 0x1ce   :  { %2562 = vmatpush3.bf16.msra.mxu1 %v3474_v7  ;;  %2404 = vmatprep.mubr.msk.f32.mxu1 %vm2771_vm1, %v3473_v9 }
 0x1cf   :  { %2563 = vmatprep.subr.bf16.mxu1 %v2770_v3 }
 0x1d2   :  { %2565 = vmatpush3.bf16.msra.mxu1 %v3475_v2 }
 0x1d3   :  { %2566 = vmatprep.subr.bf16.mxu1 %v2770_v3 }
 0x1d6   :  { %2568 = vmatpush3.bf16.msra.mxu1 %v2567_v16 }
 0x1d7   :  { %2569 = vmatprep.subr.bf16.mxu1 %v2770_v3 }
 0x1da   :  { %2571 = vmatpush3.bf16.msra.mxu1 %v2570_v17 }
 0x1db   :  { %2572 = vmatprep.subr.bf16.mxu1 %v2770_v3 }
 0x1de   :  { %2574 = vmatpush3.bf16.msra.mxu1 %v2573_v44 }
 0x1df   :  { %2575 = vmatprep.subr.bf16.mxu1 %v2770_v3 }
 0x1e2   :  { %2577 = vmatpush3.bf16.msra.mxu1 %v2576_v23 }
 0x1e3   :  { %2578 = vmatprep.subr.bf16.mxu1 %v2770_v3 }
 0x1e6   :  { %2580 = vmatpush3.bf16.msra.mxu1 %v2579_v51 }
 0x1e7   :  { %2581 = vmatprep.subr.bf16.mxu1 %v2770_v3 }
 0x1ea   :  { %2583 = vmatpush3.bf16.msra.mxu1 %v2582_v20 }
 0x1eb   :  { %2584 = vmatprep.subr.bf16.mxu1 %v2770_v3 }
 0x1ed   :  { %2405 = vmatmul.mubr.f32.vlgmr.msra.gmra.mrb[0].mxu1 %v3190_v25  ;;  %v1294_v25 = vpop.permute.xlu0 %1293 }
 0x1ee   :  { %2586 = vmatpush3.bf16.msra.mxu1 %v3202_v31  ;;  %2439 = vmatprep.mubr.msk.f32.mxu1 %vm2771_vm1, %v3473_v9 }
 0x1ef   :  { %2587 = vmatprep.subr.bf16.mxu1 %v2770_v3 }
 0x1f2   :  { %2589 = vmatpush3.bf16.msra.mxu1 %v3221_v12 }
 0x1f3   :  { %2590 = vmatprep.subr.bf16.mxu1 %v2770_v3 }
 0x1f6   :  { %2592 = vmatpush3.bf16.msra.mxu1 %v3239_v24 }
 0x1f7   :  { %2593 = vmatprep.subr.bf16.mxu1 %v2770_v3 }
 0x1fa   :  { %2595 = vmatpush3.bf16.msra.mxu1 %v3257_v39 }
 0x1fb   :  { %2596 = vmatprep.subr.bf16.mxu1 %v2770_v3 }
 0x1fe   :  { %2598 = vmatpush3.bf16.msra.mxu1 %v3275_v15 }
 0x1ff   :  { %2599 = vmatprep.subr.bf16.mxu1 %v2770_v3 }
 0x202   :  { %2601 = vmatpush3.bf16.msra.mxu1 %v3293_v55 }
 0x203   :  { %2602 = vmatprep.subr.bf16.mxu1 %v2770_v3 }
 0x206   :  { %2604 = vmatpush3.bf16.msra.mxu1 %v3305_v6 }
 0x207   :  { %2605 = vmatprep.subr.bf16.mxu1 %v2770_v3 }
 0x20a   :  { %2607 = vmatpush3.bf16.msra.mxu1 %v3321_v56 }
 0x20b   :  { %2608 = vmatprep.subr.bf16.mxu1 %v2770_v3 }
 0x20d   :  { %2440 = vmatmul.mubr.f32.vlgmr.msra.gmra.mrb[0].mxu1 %v3476_v5 }
 0x20e   :  { %2610 = vmatpush3.bf16.msra.mxu1 %v3334_v33  ;;  %2474 = vmatprep.mubr.msk.f32.mxu1 %vm2771_vm1, %v3473_v9 }
 0x20f   :  { %2611 = vmatprep.subr.bf16.mxu1 %v2770_v3 }
 0x212   :  { %2613 = vmatpush3.bf16.msra.mxu1 %v3342_v48 }
 0x213   :  { %2614 = vmatprep.subr.bf16.mxu1 %v2770_v3 }
 0x216   :  { %2616 = vmatpush3.bf16.msra.mxu1 %v3348_v36 }
 0x217   :  { %2617 = vmatprep.subr.bf16.mxu1 %v2770_v3 }
 0x21a   :  { %2619 = vmatpush3.bf16.msra.mxu1 %v3354_v35 }
 0x21b   :  { %2620 = vmatprep.subr.bf16.mxu1 %v2770_v3 }
 0x21e   :  { %2622 = vmatpush3.bf16.msra.mxu1 %v3360_v40 }
 0x21f   :  { %2623 = vmatprep.subr.bf16.mxu1 %v2770_v3 }
 0x222   :  { %2625 = vmatpush3.bf16.msra.mxu1 %v3362_v54 }
 0x223   :  { %2626 = vmatprep.subr.bf16.mxu1 %v2770_v3 }
 0x226   :  { %2628 = vmatpush3.bf16.msra.mxu1 %v3366_v28 }
 0x227   :  { %2629 = vmatprep.subr.bf16.mxu1 %v2770_v3 }
 0x22a   :  { %2631 = vmatpush3.bf16.msra.mxu1 %v3368_v38 }
 0x22b   :  { %2632 = vmatprep.subr.bf16.mxu1 %v2770_v3 }
 0x22d   :  { %2475 = vmatmul.mubr.f32.vlgmr.msra.gmra.mrb[0].mxu1 %v3187_v21 }
 0x22e   :  { %2634 = vmatpush3.bf16.msra.mxu1 %v3202_v31  ;;  %2509 = vmatprep.mubr.msk.f32.mxu1 %vm2771_vm1, %v3473_v9 }
 0x22f   :  { %2635 = vmatprep.subr.bf16.mxu1 %v2770_v3 }
 0x232   :  { %2637 = vmatpush3.bf16.msra.mxu1 %v3221_v12 }
 0x233   :  { %2638 = vmatprep.subr.bf16.mxu1 %v2770_v3 }
 0x236   :  { %2640 = vmatpush3.bf16.msra.mxu1 %v3239_v24 }
 0x237   :  { %2641 = vmatprep.subr.bf16.mxu1 %v2770_v3 }
 0x23a   :  { %2643 = vmatpush3.bf16.msra.mxu1 %v3257_v39 }
 0x23b   :  { %2644 = vmatprep.subr.bf16.mxu1 %v2770_v3 }
 0x23e   :  { %2646 = vmatpush3.bf16.msra.mxu1 %v3275_v15 }
 0x23f   :  { %2647 = vmatprep.subr.bf16.mxu1 %v2770_v3 }
 0x242   :  { %2649 = vmatpush3.bf16.msra.mxu1 %v3293_v55 }
 0x243   :  { %2650 = vmatprep.subr.bf16.mxu1 %v2770_v3 }
 0x246   :  { %2652 = vmatpush3.bf16.msra.mxu1 %v3305_v6 }
 0x247   :  { %2653 = vmatprep.subr.bf16.mxu1 %v2770_v3 }
 0x24a   :  { %2655 = vmatpush3.bf16.msra.mxu1 %v3321_v56 }
 0x24d   :  { %2510 = vmatmul.mubr.f32.vlgmr.msra.gmra.mrb[0].mxu1 %v3187_v21 }
 0x320   :  { %v1933_v18 = vpop.f32.mrb[0].mxu1 }
 0x321   :  { %v2672_v31 = vadd.f32 %v1933_v18, %v1294_v25  ;;  %v2511_v51 = vpop.f32.mrb[1].mxu1 }
 0x323   :  { %1937 = vst [vmem:[%s3466_s5] sm:$0x3] %v2672_v31 }

</bundles_post_ra>
